<compile_context>
chip_gen: v7x
topology: tpu7x:2x2x1
jax: 0.10.0
libtpu: 0.0.40
codegen_flags: <defaults>
</compile_context>

<pallas_src>
import jax
import jax.numpy as jnp
from jax.experimental import pallas as pl
from jax.experimental.pallas import tpu as pltpu


# ----------------------------------------------------------------------------
# tiling / padding helpers
# ----------------------------------------------------------------------------
def _round_up(x, m):
    return ((x + m - 1) // m) * m


def _choose_m_tiling(M, cap):
    """Return (tm, M_pad): tm a multiple of 8, M_pad a multiple of tm."""
    if M <= cap:
        tm = _round_up(max(M, 8), 8)
        return tm, tm
    tm = cap - cap % 8
    return tm, _round_up(M, tm)


def _pick_k_tile(K, cap):
    if K <= cap:
        return K                    # full-K: weight slab stays VMEM-resident
    t = (min(cap, K) // 128) * 128
    while t > 0 and K % t != 0:
        t -= 128
    return t if t > 0 else K


def _pad_rows(a, M_pad):
    M = a.shape[0]
    if M == M_pad:
        return a
    return jnp.pad(a, ((0, M_pad - M), (0, 0)))


def _pad_last(a, C_pad, value=0.0):
    C = a.shape[-1]
    if C == C_pad:
        return a
    pads = [(0, 0)] * (a.ndim - 1) + [(0, C_pad - C)]
    return jnp.pad(a, pads, constant_values=value)


# ----------------------------------------------------------------------------
# Kernel 1: conv-as-matmul with fused mask-renorm + bias (+ReLU) epilogue and
#           per-tile BatchNorm partial statistics.
# ----------------------------------------------------------------------------
def _make_conv_kernel(use_rdiv, fuse_relu, emit_stats):
    def kernel(*refs):
        it = iter(refs)
        x_ref = next(it)
        w_ref = next(it)
        b_ref = next(it)
        rdiv_ref = next(it) if use_rdiv else None
        o_ref = next(it)
        stats_ref = next(it) if emit_stats else None
        acc_ref = next(it)

        kk = pl.program_id(1)
        nk = pl.num_programs(1)

        @pl.when(kk == 0)
        def _():
            acc_ref[...] = jnp.zeros_like(acc_ref)

        acc_ref[...] += jnp.dot(x_ref[...], w_ref[...],
                                preferred_element_type=jnp.float32)

        # Epilogue only on the last k step.
        @pl.when(kk == nk - 1)
        def _():
            y = acc_ref[...]
            if use_rdiv:
                y = y * rdiv_ref[...]
            y = y + b_ref[...]
            if emit_stats:
                # per-i-tile partials: row0 = sum(y), row1 = sum(y*y)
                stats_ref[...] = jnp.zeros_like(stats_ref)
                stats_ref[0:1, :] = jnp.sum(y, axis=0, keepdims=True)
                stats_ref[1:2, :] = jnp.sum(y * y, axis=0, keepdims=True)
            if fuse_relu:
                y = jnp.maximum(y, 0.0)
            o_ref[...] = y.astype(o_ref.dtype)

    return kernel


def conv_matmul_fused(cols, w, bias, rdiv=None, *, emit_stats=True,
                      fuse_relu=False, out_dtype=jnp.float32,
                      tm=512, tk_cap=2048):
    """cols: (M_pad, K) bf16, w: (K, cout_p) bf16, bias: (1, cout_p) f32,
    rdiv: optional (M_pad, 1) f32.  M_pad must be a multiple of tm."""
    if cols.dtype != jnp.bfloat16:
        cols = cols.astype(jnp.bfloat16)
    if w.dtype != jnp.bfloat16:
        w = w.astype(jnp.bfloat16)
    M, K = cols.shape
    cout_p = w.shape[1]
    tk = _pick_k_tile(K, tk_cap)           # tk_cap sized for v7x's 64 MiB VMEM
    nm, nk = M // tm, K // tk
    use_rdiv = rdiv is not None

    in_specs = [pl.BlockSpec((tm, tk), lambda i, k: (i, k)),       # cols (bf16)
                pl.BlockSpec((tk, cout_p), lambda i, k: (k, 0)),   # w    (bf16)
                pl.BlockSpec((1, cout_p), lambda i, k: (0, 0))]    # bias (f32)
    inputs = [cols, w, bias]
    if use_rdiv:
        in_specs.append(pl.BlockSpec((tm, 1), lambda i, k: (i, 0)))  # 1/mask_sum
        inputs.append(rdiv)

    out_shapes = [jax.ShapeDtypeStruct((M, cout_p), out_dtype)]
    out_specs = [pl.BlockSpec((tm, cout_p), lambda i, k: (i, 0))]
    if emit_stats:
        out_shapes.append(jax.ShapeDtypeStruct((nm * 8, cout_p), jnp.float32))
        out_specs.append(pl.BlockSpec((8, cout_p), lambda i, k: (i, 0)))

    kernel = _make_conv_kernel(use_rdiv, fuse_relu, emit_stats)

    result = pl.pallas_call(
        kernel,
        out_shape=tuple(out_shapes) if emit_stats else out_shapes[0],
        grid_spec=pltpu.PrefetchScalarGridSpec(
            num_scalar_prefetch=0,
            grid=(nm, nk),
            in_specs=in_specs,
            out_specs=tuple(out_specs) if emit_stats else out_specs[0],
            scratch_shapes=[pltpu.VMEM((tm, cout_p), jnp.float32)],
        ),
        # No cross-i accumulation (per-tile stats) -> i axis is "parallel"
        # (2-TensorCore sharding on v7x); k (reduction) stays "arbitrary".
        compiler_params=pltpu.CompilerParams(
            dimension_semantics=("parallel", "arbitrary"),
            vmem_limit_bytes=32 * 1024 * 1024),
    )(*inputs)

    if emit_stats:
        return result[0], result[1]
    return result, None


# ----------------------------------------------------------------------------
# Kernel 2: PartialConv2d mask window sums -> new_mask and 1/clamped divisor
# ----------------------------------------------------------------------------
def _mask_window_kernel(mc_ref, nm_ref, rdiv_ref):
    s = jnp.sum(mc_ref[...], axis=1, keepdims=True)
    zero = s == 0.0
    nm_ref[...] = jnp.where(zero, 0.0, 1.0)
    safe = jnp.where(zero, 1.0, s)            # mask[mask==0] = 1
    rdiv_ref[...] = 1.0 / safe


def mask_window(mcols, tm):
    M, KK = mcols.shape
    return pl.pallas_call(
        _mask_window_kernel,
        out_shape=(jax.ShapeDtypeStruct((M, 1), jnp.float32),
                   jax.ShapeDtypeStruct((M, 1), jnp.float32)),
        grid_spec=pltpu.PrefetchScalarGridSpec(
            num_scalar_prefetch=0,
            grid=(M // tm,),
            in_specs=[pl.BlockSpec((tm, KK), lambda i: (i, 0))],
            out_specs=(pl.BlockSpec((tm, 1), lambda i: (i, 0)),
                       pl.BlockSpec((tm, 1), lambda i: (i, 0))),
        ),
        compiler_params=pltpu.CompilerParams(
            dimension_semantics=("parallel",)),
    )(mcols)


# ----------------------------------------------------------------------------
# Kernel 3: fused BatchNorm affine + ReLU (bf16 in, f32 out, lane-dense tiles)
# ----------------------------------------------------------------------------
def _affine_relu_kernel(x_ref, scale_ref, shift_ref, o_ref):
    y = x_ref[...].astype(jnp.float32) * scale_ref[...] + shift_ref[...]
    o_ref[...] = jnp.maximum(y, 0.0)


def affine_relu(y, scale, shift, tm):
    M, C = y.shape
    return pl.pallas_call(
        _affine_relu_kernel,
        out_shape=jax.ShapeDtypeStruct((M, C), jnp.float32),
        grid_spec=pltpu.PrefetchScalarGridSpec(
            num_scalar_prefetch=0,
            grid=(M // tm,),
            in_specs=[pl.BlockSpec((tm, C), lambda i: (i, 0)),
                      pl.BlockSpec((1, C), lambda i: (0, 0)),
                      pl.BlockSpec((1, C), lambda i: (0, 0))],
            out_specs=pl.BlockSpec((tm, C), lambda i: (i, 0)),
        ),
        compiler_params=pltpu.CompilerParams(
            dimension_semantics=("parallel",)),
    )(y, scale, shift)


# ----------------------------------------------------------------------------
# Plain-JAX glue: im2col patch extraction (layout only, no math, runs in bf16)
# TODO(synk): fuse patch extraction into the matmul via halo BlockSpecs to
# avoid the k^2 HBM blow-up of the cols array.
# ----------------------------------------------------------------------------
def im2col(x, k, stride, pad):
    # x: (N, H, W, C) -> (N*Ho*Wo, k*k*C), row layout [kh, kw, cin]
    N, H, W, C = x.shape
    Ho = (H + 2 * pad - k) // stride + 1
    Wo = (W + 2 * pad - k) // stride + 1
    xp = jnp.pad(x, ((0, 0), (pad, pad), (pad, pad), (0, 0)))
    cols = []
    for kh in range(k):
        for kw in range(k):
            cols.append(xp[:, kh:kh + stride * Ho:stride,
                           kw:kw + stride * Wo:stride, :])
    patches = jnp.stack(cols, axis=3)          # (N, Ho, Wo, k*k, C)
    return patches.reshape(N * Ho * Wo, k * k * C), Ho, Wo


# ----------------------------------------------------------------------------
# Parameters (deterministic; matches a freshly constructed module)
# ----------------------------------------------------------------------------
def init_params(key, cin_total, cout, k, use_pconv):
    k1, k2 = jax.random.split(key)
    # PyTorch Conv2d weight (Cout, Cin, kh, kw) -> im2col layout (k*k*Cin, Cout)
    w = 0.05 * jax.random.normal(k1, (cout, cin_total, k, k), jnp.float32)
    w2 = jnp.transpose(w, (2, 3, 1, 0)).reshape(k * k * cin_total, cout)
    if use_pconv:
        bias = jnp.zeros((1, cout), jnp.float32)   # PartialConv2d bias zero-init
    else:
        bias = 0.05 * jax.random.normal(k2, (1, cout), jnp.float32)
    gamma = jnp.ones((1, cout), jnp.float32)       # fresh BatchNorm2d defaults
    beta = jnp.zeros((1, cout), jnp.float32)
    return {"w2": w2, "bias": bias, "gamma": gamma, "beta": beta}


# ----------------------------------------------------------------------------
# BasicBlock forward
# ----------------------------------------------------------------------------
def basic_block_forward(x_nchw, params, cfg, mask_nchw=None, skip_nchw=None):
    k, stride, pad = cfg["kernel_size"], cfg["stride"], cfg["padding"]
    eps = 1e-5
    no_norm = cfg["no_norm"]
    use_pconv = cfg["use_pconv"]

    # NCHW -> NHWC; keep activations bf16 end-to-end so the im2col patches are
    # materialized directly in bf16 (halves the biggest HBM intermediate).
    x = jnp.transpose(x_nchw, (0, 2, 3, 1)).astype(jnp.bfloat16)

    if cfg["upsample_first"]:
        # nn.Upsample(scale_factor=2, mode='nearest'): pure data replication.
        x = jnp.repeat(jnp.repeat(x, 2, axis=1), 2, axis=2)

    if skip_nchw is not None:
        skip = jnp.transpose(skip_nchw, (0, 2, 3, 1)).astype(jnp.bfloat16)
        x = jnp.concatenate([x, skip], axis=-1)      # torch.cat(..., dim=1)

    N = x.shape[0]

    if use_pconv:
        m = jnp.transpose(mask_nchw, (0, 2, 3, 1)).astype(jnp.float32)
        x = x * m.astype(jnp.bfloat16)               # exact: mask in {0,1}

    cols, Ho, Wo = im2col(x, k, stride, pad)         # bf16, (M, k*k*Cin)
    M = cols.shape[0]
    tm, M_pad = _choose_m_tiling(M, 512)
    cols = _pad_rows(cols, M_pad)                    # zero rows -> y = bias

    # Lane-dense Cout: pad to a multiple of 128, slice off at the end.
    cout = params["w2"].shape[1]
    cout_p = _round_up(max(cout, 128), 128)
    w2 = _pad_last(params["w2"], cout_p).astype(jnp.bfloat16)
    bias = _pad_last(params["bias"], cout_p)

    if use_pconv:
        mcols, _, _ = im2col(m, k, stride, pad)      # f32, (M, k*k)
        mcols = _pad_rows(mcols, M_pad)              # padded rows -> rdiv = 1
        new_mask_flat, rdiv = mask_window(mcols, tm)     # Pallas kernel
    else:
        new_mask_flat, rdiv = None, None

    # conv (+ mask renorm + bias [+ReLU]) with fused BN partial-stats epilogue
    y, stats = conv_matmul_fused(
        cols, w2, bias, rdiv,
        emit_stats=not no_norm,
        fuse_relu=no_norm,                               # skip affine_relu pass
        out_dtype=jnp.float32 if no_norm else jnp.bfloat16,
        tm=tm)

    if no_norm:
        out_flat = y                                      # ReLU already applied
    else:
        # training-mode BatchNorm2d batch statistics (biased variance)
        stats = stats.reshape(-1, 8, cout_p)
        s = jnp.sum(stats[:, 0, :], axis=0, keepdims=True)
        sq = jnp.sum(stats[:, 1, :], axis=0, keepdims=True)
        n_pad = M_pad - M
        if n_pad:
            # zero-padded rows contribute exactly y = bias each -> exact fixup
            s = s - n_pad * bias
            sq = sq - n_pad * bias * bias
        mean = s / M
        var = jnp.maximum(sq / M - mean * mean, 0.0)      # clamp cancellation
        invstd = 1.0 / jnp.sqrt(var + eps)
        scale = _pad_last(params["gamma"], cout_p, 1.0) * invstd
        shift = _pad_last(params["beta"], cout_p) - mean * scale
        tm_aff = tm
        while tm_aff * 2 <= 2048 and M_pad % (tm_aff * 2) == 0:
            tm_aff *= 2                                   # wide elementwise tiles
        out_flat = affine_relu(y, scale, shift, tm_aff)   # Pallas fused pass

    out = jnp.transpose(out_flat[:M, :cout].reshape(N, Ho, Wo, cout),
                        (0, 3, 1, 2))                     # -> NCHW
    if use_pconv:
        new_mask = jnp.transpose(new_mask_flat[:M].reshape(N, Ho, Wo, 1),
                                 (0, 3, 1, 2))
        return out, new_mask
    return out


if __name__ == "__main__":
    key = jax.random.PRNGKey(0)
    kx, ks, kp1, kp2 = jax.random.split(key, 4)

    # ---- Config A: upsample + skip-concat + PartialConv2d + BatchNorm + ReLU
    cfg_a = dict(upsample_first=True, use_pconv=True, no_norm=False,
                 kernel_size=3, stride=1, padding=1)
    x_a = jax.random.normal(kx, (2, 4, 16, 16), jnp.float32)
    skip_a = jax.random.normal(ks, (2, 4, 32, 32), jnp.float32)
    # mask matches the (upsampled, concatenated) conv input spatial size; has a hole
    mask_a = jnp.ones((2, 1, 32, 32), jnp.float32)
    mask_a = mask_a.at[:, :, 8:16, 8:16].set(0.0)
    params_a = init_params(kp1, cin_total=8, cout=8, k=3, use_pconv=True)

    out_a, new_mask = basic_block_forward(x_a, params_a, cfg_a,
                                          mask_nchw=mask_a, skip_nchw=skip_a)
    out_a = jax.block_until_ready(out_a)
    new_mask = jax.block_until_ready(new_mask)
    assert out_a.shape == (2, 8, 32, 32), out_a.shape
    assert new_mask.shape == (2, 1, 32, 32), new_mask.shape
    assert bool(jnp.all(jnp.isfinite(out_a)))
    assert bool(jnp.all(out_a >= 0.0))                         # ReLU range
    assert bool(jnp.all((new_mask == 0.0) | (new_mask == 1.0)))
    assert bool(jnp.any(new_mask == 0.0)) and bool(jnp.any(new_mask == 1.0))

    # ---- Config B: plain Conv2d(k=4, s=2, p=1), no norm, ReLU only
    cfg_b = dict(upsample_first=False, use_pconv=False, no_norm=True,
                 kernel_size=4, stride=2, padding=1)
    params_b = init_params(kp2, cin_total=4, cout=8, k=4, use_pconv=False)

    out_b = basic_block_forward(x_a, params_b, cfg_b)
    out_b = jax.block_until_ready(out_b)
    assert out_b.shape == (2, 8, 8, 8), out_b.shape
    assert bool(jnp.all(jnp.isfinite(out_b)))
    assert bool(jnp.all(out_b >= 0.0))

    print("KERNEL_OK")
</pallas_src>

<mosaic_0001>
module attributes {stable_mosaic.version = 11 : i64} {
  func.func @_mask_window_kernel(%arg0: i32, %arg1: memref<512x9xf32, #tpu.memory_space<vmem>>, %arg2: memref<512x1xf32, #tpu.memory_space<vmem>>, %arg3: memref<512x1xf32, #tpu.memory_space<vmem>>) attributes {dimension_semantics = [#tpu.dimension_semantics<parallel>], iteration_bounds = array<i64: 4>, scalar_prefetch = 0 : i64, scratch_operands = 0 : i64, tpu.core_type = #tpu.core_type<tc>, window_params = [{transform_indices = @transform_0, window_bounds = array<i64: 512, 9>}, {transform_indices = @transform_1, window_bounds = array<i64: 512, 1>}, {transform_indices = @transform_2, window_bounds = array<i64: 512, 1>}]} {
    %c0 = arith.constant 0 : index
    %c0_0 = arith.constant 0 : index
    %0 = vector.load %arg1[%c0, %c0_0] : memref<512x9xf32, #tpu.memory_space<vmem>>, vector<512x9xf32>
    %cst = arith.constant dense<0.000000e+00> : vector<512xf32>
    %1 = vector.multi_reduction <add>, %0, %cst [1] : vector<512x9xf32> to vector<512xf32>
    %2 = vector.shape_cast %1 : vector<512xf32> to vector<512x1xf32>
    %cst_1 = arith.constant 0.000000e+00 : f32
    %3 = vector.broadcast %cst_1 : f32 to vector<512x1xf32>
    %4 = arith.cmpf oeq, %2, %3 : vector<512x1xf32>
    %cst_2 = arith.constant 0.000000e+00 : f32
    %cst_3 = arith.constant 1.000000e+00 : f32
    %5 = vector.broadcast %cst_2 : f32 to vector<512x1xf32>
    %6 = vector.broadcast %cst_3 : f32 to vector<512x1xf32>
    %7 = arith.select %4, %5, %6 : vector<512x1xi1>, vector<512x1xf32>
    %c0_4 = arith.constant 0 : index
    %c0_5 = arith.constant 0 : index
    %8 = vector.load %arg2[%c0_4, %c0_5] : memref<512x1xf32, #tpu.memory_space<vmem>>, vector<512x1xf32>
    tpu.vector_store %arg2[%c0_4, %c0_5], %7 {strides = array<i32>} : memref<512x1xf32, #tpu.memory_space<vmem>>, vector<512x1xf32>,
    %cst_6 = arith.constant 1.000000e+00 : f32
    %9 = vector.broadcast %cst_6 : f32 to vector<512x1xf32>
    %10 = arith.select %4, %9, %2 : vector<512x1xi1>, vector<512x1xf32>
    %cst_7 = arith.constant 1.000000e+00 : f32
    %11 = vector.broadcast %cst_7 : f32 to vector<512x1xf32>
    %12 = arith.divf %11, %10 : vector<512x1xf32>
    %c0_8 = arith.constant 0 : index
    %c0_9 = arith.constant 0 : index
    %13 = vector.load %arg3[%c0_8, %c0_9] : memref<512x1xf32, #tpu.memory_space<vmem>>, vector<512x1xf32>
    tpu.vector_store %arg3[%c0_8, %c0_9], %12 {strides = array<i32>} : memref<512x1xf32, #tpu.memory_space<vmem>>, vector<512x1xf32>,
    return
  }
  func.func @transform_0(%arg0: i32) -> (i32, i32) {
    %c0_i32 = arith.constant 0 : i32
    %c0_i32_0 = arith.constant 0 : i32
    return %arg0, %c0_i32 : i32, i32
  }
  func.func @transform_1(%arg0: i32) -> (i32, i32) {
    %c0_i32 = arith.constant 0 : i32
    %c0_i32_0 = arith.constant 0 : i32
    return %arg0, %c0_i32 : i32, i32
  }
  func.func @transform_2(%arg0: i32) -> (i32, i32) {
    %c0_i32 = arith.constant 0 : i32
    %c0_i32_0 = arith.constant 0 : i32
    return %arg0, %c0_i32 : i32, i32
  }
}

</mosaic_0001>

<bundles_post_ra>
// kernel: tpu_custom_call.1
= control target key start
LH: loop header
LB: loop body
LE: loop exit
PB: predicated region body
PF: predicated region fallthrough
CT: control target
= control target key end

     0   :  { %s1131_s9 = smov 0   ;;  %s1712_s0 = inlined_call_operand.vmem [shape: f32[2048,9], index: 0, kind: input, shape index: {}]   ;;  %s1713_s1 = inlined_call_operand.vmem [shape: f32[2048,1], index: 1, kind: output, shape index: {0}]   ;;  %s1714_s2 = inlined_call_operand.vmem [shape: f32[2048,1], index: 2, kind: output, shape index: {1}]  }
   0x1 LB: > { %s957_s10 = sadd.s32 4294967295, %s1113_s9   ;;  %p961_p0 = scmp.ge.s32.totalorder %s1113_s9, 1  ;;  %s1113_s9 = sphi %s1131_s9, %s13_s9  }
   0x2   : > { %p116_p1 = scmp.lt.s32.totalorder %s1113_s9, 5 }
   0x4   : > { %p117_p2 = pnand %p961_p0, %p116_p1 }
   0x5   : > { %s962_s11 = sshll.u32 (!%p117_p2), %s957_s10, 6  ;;  %vm225_vm0 = vcmask (!%p117_p2), 72704   ;;  %vm546_vm1 = vcmask (!%p117_p2), 7168  }
   0x6   : > { %120 = sbr.rel (%p117_p2) target bundleno = 299 (0x12b), region = 24  ;;  %p144_p3 = scmp.lt.s32.totalorder (!%p117_p2), %s962_s11, 255 }
   0xd   : > { %s1716_s11 = smov (!%p144_p3, %s962_s11), 255 }
   0xe   : > { %s1139_s12 = sshll.u32 %s1716_s11, 3 }
   0xf   : > { %s1145_s15 = scalar_lea.vmem %s1712_s0, %s1139_s12  ;;  %s1381_s18 = scalar_lea.vmem %s1713_s1, %s1139_s12 }
  0x10   : > { %v163_v0 = vld [vmem:[%s1145_s15 + $0x10] sm:$0xff]  ;;  %v161_v1 = vld [vmem:[%s1145_s15] sm:$0xff]  ;;  %v164_v2 = vld [vmem:[%s1145_s15 + $0x18] sm:$0xff]  ;;  %s1401_s21 = scalar_lea.vmem %s1714_s2, %s1139_s12 }
  0x11   : > { %v232_v3 = vsel %vm225_vm0, %v163_v0, 0.0  ;;  %v226_v4 = vsel %vm225_vm0, %v161_v1, 0.0  ;;  %v162_v5 = vld [vmem:[%s1145_s15 + $0x8] sm:$0xff]  ;;  %v235_v6 = vsel %vm225_vm0, %v164_v2, 0.0  ;;  %v165_v9 = vld [vmem:[%s1145_s15 + $0x20] sm:$0xff]  ;;  %v168_v10 = vld [vmem:[%s1145_s15 + $0x38] sm:$0xff] }
  0x12   : > { %233 = vadd.xlane.f32.xlu1 %v232_v3  ;;  %227 = vadd.xlane.f32.xlu0 %v226_v4  ;;  %v229_v7 = vsel %vm225_vm0, %v162_v5, 0.0  ;;  %v166_v8 = vld [vmem:[%s1145_s15 + $0x28] sm:$0xff]  ;;  %v238_v12 = vsel %vm225_vm0, %v165_v9, 0.0  ;;  %v167_v13 = vld [vmem:[%s1145_s15 + $0x30] sm:$0xff]  ;;  %v169_v15 = vld [vmem:[%s1145_s15 + $0x40] sm:$0xff]  ;;  %v247_v18 = vsel %vm225_vm0, %v168_v10, 0.0 }
  0x13   : > { %v241_v11 = vsel %vm225_vm0, %v166_v8, 0.0  ;;  %v170_v14 = vld [vmem:[%s1145_s15 + $0x48] sm:$0xff]  ;;  %v172_v16 = vld [vmem:[%s1145_s15 + $0x58] sm:$0xff]  ;;  %v171_v17 = vld [vmem:[%s1145_s15 + $0x50] sm:$0xff]  ;;  %v244_v19 = vsel %vm225_vm0, %v167_v13, 0.0  ;;  %v250_v21 = vsel %vm225_vm0, %v169_v15, 0.0 }
  0x14   : > { %v253_v20 = vsel %vm225_vm0, %v170_v14, 0.0  ;;  %v194_v22 = vld [vmem:[%s1145_s15 + $0x108] sm:$0xff]  ;;  %v1171_v23 = vsel %vm225_vm0, %v172_v16, 0.0  ;;  %v1174_v24 = vsel %vm225_vm0, %v171_v17, 0.0  ;;  %v193_v26 = vld [vmem:[%s1145_s15 + $0x100] sm:$0xff]  ;;  %v196_v27 = vld [vmem:[%s1145_s15 + $0x118] sm:$0xff] }
  0x15   : > { %v1177_v25 = vsel %vm225_vm0, %v194_v22, 0.0  ;;  %v195_v28 = vld [vmem:[%s1145_s15 + $0x110] sm:$0xff]  ;;  %v1183_v29 = vsel %vm225_vm0, %v193_v26, 0.0  ;;  %v1186_v30 = vsel %vm225_vm0, %v196_v27, 0.0  ;;  %v198_v32 = vld [vmem:[%s1145_s15 + $0x128] sm:$0xff]  ;;  %v197_v33 = vld [vmem:[%s1145_s15 + $0x120] sm:$0xff] }
  0x16   : > { %236 = vadd.xlane.f32.xlu1 %v235_v6  ;;  %230 = vadd.xlane.f32.xlu0 %v229_v7  ;;  %v1189_v31 = vsel %vm225_vm0, %v195_v28, 0.0  ;;  %v200_v34 = vld [vmem:[%s1145_s15 + $0x138] sm:$0xff]  ;;  %v1195_v35 = vsel %vm225_vm0, %v198_v32, 0.0  ;;  %v1198_v36 = vsel %vm225_vm0, %v197_v33, 0.0  ;;  %v199_v38 = vld [vmem:[%s1145_s15 + $0x130] sm:$0xff]  ;;  %v202_v39 = vld [vmem:[%s1145_s15 + $0x148] sm:$0xff] }
  0x17   : > { %v1201_v37 = vsel %vm225_vm0, %v200_v34, 0.0  ;;  %v201_v40 = vld [vmem:[%s1145_s15 + $0x140] sm:$0xff]  ;;  %v1207_v41 = vsel %vm225_vm0, %v199_v38, 0.0  ;;  %v1210_v42 = vsel %vm225_vm0, %v202_v39, 0.0  ;;  %v204_v44 = vld [vmem:[%s1145_s15 + $0x158] sm:$0xff]  ;;  %v203_v45 = vld [vmem:[%s1145_s15 + $0x150] sm:$0xff] }
  0x18   : > { %v1213_v43 = vsel %vm225_vm0, %v201_v40, 0.0  ;;  %v206_v46 = vld [vmem:[%s1145_s15 + $0x168] sm:$0xff]  ;;  %v1219_v47 = vsel %vm225_vm0, %v204_v44, 0.0  ;;  %v1222_v48 = vsel %vm225_vm0, %v203_v45, 0.0  ;;  %v205_v50 = vld [vmem:[%s1145_s15 + $0x160] sm:$0xff]  ;;  %v208_v51 = vld [vmem:[%s1145_s15 + $0x178] sm:$0xff] }
  0x19   : > { %v1225_v49 = vsel %vm225_vm0, %v206_v46, 0.0  ;;  %v207_v52 = vld [vmem:[%s1145_s15 + $0x170] sm:$0xff]  ;;  %v1231_v53 = vsel %vm225_vm0, %v205_v50, 0.0  ;;  %v1234_v54 = vsel %vm225_vm0, %v208_v51, 0.0  ;;  %v210_v56 = vld [vmem:[%s1145_s15 + $0x188] sm:$0xff]  ;;  %v209_v57 = vld [vmem:[%s1145_s15 + $0x180] sm:$0xff] }
  0x1a   : > { %242 = vadd.xlane.f32.xlu1 %v241_v11  ;;  %239 = vadd.xlane.f32.xlu0 %v238_v12  ;;  %v1237_v55 = vsel %vm225_vm0, %v207_v52, 0.0  ;;  %v212_v58 = vld [vmem:[%s1145_s15 + $0x198] sm:$0xff]  ;;  %v1243_v59 = vsel %vm225_vm0, %v210_v56, 0.0  ;;  %v1246_v60 = vsel %vm225_vm0, %v209_v57, 0.0  ;;  %v211_v62 = vld [vmem:[%s1145_s15 + $0x190] sm:$0xff]  ;;  %v214_v63 = vld [vmem:[%s1145_s15 + $0x1a8] sm:$0xff] }
  0x1b   : > { %v1249_v61 = vsel %vm225_vm0, %v212_v58, 0.0  ;;  %v213_v0 = vld [vmem:[%s1145_s15 + $0x1a0] sm:$0xff]  ;;  %v174_v1 = vld [vmem:[%s1145_s15 + $0x68] sm:$0xff]  ;;  %v1257_v3 = vsel %vm225_vm0, %v211_v62, 0.0  ;;  %v1260_v4 = vsel %vm225_vm0, %v214_v63, 0.0  ;;  %v216_v6 = vld [vmem:[%s1145_s15 + $0x1b8] sm:$0xff] }
  0x1c   : > { %v173_v2 = vld [vmem:[%s1145_s15 + $0x60] sm:$0xff]  ;;  %v1263_v5 = vsel %vm225_vm0, %v213_v0, 0.0  ;;  %v215_v7 = vld [vmem:[%s1145_s15 + $0x1b0] sm:$0xff]  ;;  %v218_v8 = vld [vmem:[%s1145_s15 + $0x1c8] sm:$0xff]  ;;  %v1269_v9 = vsel %vm225_vm0, %v216_v6, 0.0  ;;  %v265_v32 = vsel %vm225_vm0, %v174_v1, 0.0 }
  0x1d   : > { %v1272_v10 = vsel %vm225_vm0, %v215_v7, 0.0  ;;  %v1275_v11 = vsel %vm225_vm0, %v218_v8, 0.0  ;;  %v217_v12 = vld [vmem:[%s1145_s15 + $0x1c0] sm:$0xff]  ;;  %v220_v13 = vld [vmem:[%s1145_s15 + $0x1d8] sm:$0xff]  ;;  %v219_v14 = vld [vmem:[%s1145_s15 + $0x1d0] sm:$0xff]  ;;  %v262_v33 = vsel %vm225_vm0, %v173_v2, 0.0 }
  0x1e   : > { %248 = vadd.xlane.f32.xlu1 %v247_v18  ;;  %245 = vadd.xlane.f32.xlu0 %v244_v19  ;;  %v1281_v15 = vsel %vm225_vm0, %v217_v12, 0.0  ;;  %v1284_v16 = vsel %vm225_vm0, %v220_v13, 0.0  ;;  %v1287_v17 = vsel %vm225_vm0, %v219_v14, 0.0  ;;  %v222_v18 = vld [vmem:[%s1145_s15 + $0x1e8] sm:$0xff]  ;;  %v221_v19 = vld [vmem:[%s1145_s15 + $0x1e0] sm:$0xff]  ;;  %v223_v27 = vld [vmem:[%s1145_s15 + $0x1f0] sm:$0xff] }
  0x1f   : > { %v1296_v22 = vsel %vm225_vm0, %v221_v19, 0.0  ;;  %v1305_v28 = vsel %vm225_vm0, %v223_v27, 0.0  ;;  %v176_v34 = vld [vmem:[%s1145_s15 + $0x78] sm:$0xff]  ;;  %v175_v38 = vld [vmem:[%s1145_s15 + $0x70] sm:$0xff]  ;;  %v177_v40 = vld [vmem:[%s1145_s15 + $0x80] sm:$0xff] }
  0x20   : > { %v271_v39 = vsel %vm225_vm0, %v176_v34, 0.0  ;;  %v274_v45 = vsel %vm225_vm0, %v177_v40, 0.0  ;;  %v180_v46 = vld [vmem:[%s1145_s15 + $0x98] sm:$0xff]  ;;  %v179_v50 = vld [vmem:[%s1145_s15 + $0x90] sm:$0xff]  ;;  %v182_v56 = vld [vmem:[%s1145_s15 + $0xa8] sm:$0xff] }
  0x21   : > { %v283_v51 = vsel %vm225_vm0, %v180_v46, 0.0  ;;  %v280_v52 = vsel %vm225_vm0, %v179_v50, 0.0  ;;  %v181_v57 = vld [vmem:[%s1145_s15 + $0xa0] sm:$0xff]  ;;  %v289_v58 = vsel %vm225_vm0, %v182_v56, 0.0  ;;  %v184_v63 = vld [vmem:[%s1145_s15 + $0xb8] sm:$0xff]  ;;  %v183_v0 = vld [vmem:[%s1145_s15 + $0xb0] sm:$0xff] }
  0x22   : > { %254 = vadd.xlane.f32.xlu1 %v253_v20  ;;  %251 = vadd.xlane.f32.xlu0 %v250_v21  ;;  %v224_v20 = vld [vmem:[%s1145_s15 + $0x1f8] sm:$0xff]  ;;  %v1293_v21 = vsel %vm225_vm0, %v222_v18, 0.0  ;;  %v286_v62 = vsel %vm225_vm0, %v181_v57, 0.0  ;;  %v295_v1 = vsel %vm225_vm0, %v184_v63, 0.0  ;;  %v292_v2 = vsel %vm225_vm0, %v183_v0, 0.0  ;;  %v186_v6 = vld [vmem:[%s1145_s15 + $0xc8] sm:$0xff] }
  0x23   : > { %v1299_v26 = vsel %vm225_vm0, %v224_v20, 0.0  ;;  %v185_v7 = vld [vmem:[%s1145_s15 + $0xc0] sm:$0xff]  ;;  %v301_v8 = vsel %vm225_vm0, %v186_v6, 0.0  ;;  %v188_v13 = vld [vmem:[%s1145_s15 + $0xd8] sm:$0xff]  ;;  %v187_v14 = vld [vmem:[%s1145_s15 + $0xd0] sm:$0xff] }
  0x24   : > { %v298_v12 = vsel %vm225_vm0, %v185_v7, 0.0  ;;  %v307_v18 = vsel %vm225_vm0, %v188_v13, 0.0  ;;  %v304_v19 = vsel %vm225_vm0, %v187_v14, 0.0  ;;  %v190_v20 = vld [vmem:[%s1145_s15 + $0xe8] sm:$0xff]  ;;  %v189_v27 = vld [vmem:[%s1145_s15 + $0xe0] sm:$0xff]  ;;  %v192_v34 = vld [vmem:[%s1145_s15 + $0xf8] sm:$0xff] }
  0x26   : > { %260 = vadd.xlane.f32.xlu1 %v1171_v23  ;;  %257 = vadd.xlane.f32.xlu0 %v1174_v24  ;;  %v268_v23 = vsel %vm225_vm0, %v175_v38, 0.0  ;;  %v178_v24 = vld [vmem:[%s1145_s15 + $0x88] sm:$0xff]  ;;  %v191_v38 = vld [vmem:[%s1145_s15 + $0xf0] sm:$0xff] }
  0x27   : > { %v277_v44 = vsel %vm225_vm0, %v178_v24, 0.0 }
  0x2a   : > { %266 = vadd.xlane.f32.xlu1 %v265_v32  ;;  %263 = vadd.xlane.f32.xlu0 %v262_v33  ;;  %v313_v32 = vsel %vm225_vm0, %v190_v20, 0.0  ;;  %v310_v33 = vsel %vm225_vm0, %v189_v27, 0.0 }
  0x2e   : > { %272 = vadd.xlane.f32.xlu1 %v271_v39  ;;  %269 = vadd.xlane.f32.xlu0 %v268_v23  ;;  %v319_v39 = vsel %vm225_vm0, %v192_v34, 0.0  ;;  %v316_v23 = vsel %vm225_vm0, %v191_v38, 0.0 }
  0x32   : > { %278 = vadd.xlane.f32.xlu1 %v277_v44  ;;  %275 = vadd.xlane.f32.xlu0 %v274_v45 }
  0x36   : > { %284 = vadd.xlane.f32.xlu1 %v283_v51  ;;  %281 = vadd.xlane.f32.xlu0 %v280_v52 }
  0x3a   : > { %290 = vadd.xlane.f32.xlu1 %v289_v58  ;;  %287 = vadd.xlane.f32.xlu0 %v286_v62 }
  0x3e   : > { %296 = vadd.xlane.f32.xlu1 %v295_v1  ;;  %293 = vadd.xlane.f32.xlu0 %v292_v2 }
  0x42   : > { %302 = vadd.xlane.f32.xlu1 %v301_v8  ;;  %299 = vadd.xlane.f32.xlu0 %v298_v12 }
  0x46   : > { %308 = vadd.xlane.f32.xlu1 %v307_v18  ;;  %305 = vadd.xlane.f32.xlu0 %v304_v19 }
  0x4a   : > { %314 = vadd.xlane.f32.xlu1 %v313_v32  ;;  %311 = vadd.xlane.f32.xlu0 %v310_v33 }
  0x4e   : > { %320 = vadd.xlane.f32.xlu1 %v319_v39  ;;  %317 = vadd.xlane.f32.xlu0 %v316_v23 }
  0x52   : > { %326 = vadd.xlane.f32.xlu1 %v1177_v25  ;;  %323 = vadd.xlane.f32.xlu0 %v1183_v29 }
  0x56   : > { %332 = vadd.xlane.f32.xlu1 %v1186_v30  ;;  %329 = vadd.xlane.f32.xlu0 %v1189_v31  ;;  %v1115_v30 = vmov 1.0  }
  0x5a   : > { %338 = vadd.xlane.f32.xlu1 %v1195_v35  ;;  %335 = vadd.xlane.f32.xlu0 %v1198_v36 }
  0x5e   : > { %344 = vadd.xlane.f32.xlu1 %v1201_v37  ;;  %341 = vadd.xlane.f32.xlu0 %v1207_v41 }
  0x62   : > { %350 = vadd.xlane.f32.xlu1 %v1210_v42  ;;  %347 = vadd.xlane.f32.xlu0 %v1213_v43 }
  0x66   : > { %356 = vadd.xlane.f32.xlu1 %v1219_v47  ;;  %353 = vadd.xlane.f32.xlu0 %v1222_v48 }
  0x6a   : > { %362 = vadd.xlane.f32.xlu1 %v1225_v49  ;;  %359 = vadd.xlane.f32.xlu0 %v1231_v53 }
  0x6e   : > { %368 = vadd.xlane.f32.xlu1 %v1234_v54  ;;  %365 = vadd.xlane.f32.xlu0 %v1237_v55 }
  0x72   : > { %374 = vadd.xlane.f32.xlu1 %v1243_v59  ;;  %371 = vadd.xlane.f32.xlu0 %v1246_v60 }
  0x76   : > { %380 = vadd.xlane.f32.xlu1 %v1249_v61  ;;  %377 = vadd.xlane.f32.xlu0 %v1257_v3 }
  0x7a   : > { %386 = vadd.xlane.f32.xlu1 %v1260_v4  ;;  %383 = vadd.xlane.f32.xlu0 %v1263_v5 }
  0x7e   : > { %392 = vadd.xlane.f32.xlu1 %v1269_v9  ;;  %389 = vadd.xlane.f32.xlu0 %v1272_v10 }
  0x82   : > { %398 = vadd.xlane.f32.xlu1 %v1275_v11  ;;  %395 = vadd.xlane.f32.xlu0 %v1281_v15 }
  0x86   : > { %404 = vadd.xlane.f32.xlu1 %v1284_v16  ;;  %401 = vadd.xlane.f32.xlu0 %v1287_v17 }
  0x8a   : > { %410 = vadd.xlane.f32.xlu1 %v1293_v21  ;;  %407 = vadd.xlane.f32.xlu0 %v1296_v22 }
  0x8e   : > { %416 = vadd.xlane.f32.xlu1 %v1299_v26  ;;  %413 = vadd.xlane.f32.xlu0 %v1305_v28 }
  0x9f   : > { %v234_v25 = vpop.xlane.xlu1 %233  ;;  %v228_v29 = vpop.xlane.xlu0 %227 }
  0xa0   : > { %vm420_vm2 = vcmp.eq.f32.partialorder %v234_v25, 0.0  ;;  %vm418_vm3 = vcmp.eq.f32.partialorder %v228_v29, 0.0 }
  0xa1   : > { %v484_v31 = vsel %vm420_vm2, 0.0, %v1115_v30  ;;  %v613_v35 = vsel %vm420_vm2, 1.0, %v234_v25  ;;  %v482_v36 = vsel %vm418_vm3, 0.0, %v1115_v30  ;;  %v611_v37 = vsel %vm418_vm3, 1.0, %v228_v29 }
  0xa2   : > { %549 = vst.msk [vmem:[%s1381_s18 + $0x10] sm:$0xff] %vm546_vm1, %v484_v31  ;;  %979 = vrcp.f32 %v613_v35  ;;  %547 = vst.msk [vmem:[%s1381_s18] sm:$0xff] %vm546_vm1, %v482_v36 }
  0xa3   : > { %981 = vrcp.f32 %v611_v37  ;;  %v237_v41 = vpop.xlane.xlu1 %236  ;;  %v231_v42 = vpop.xlane.xlu0 %230 }
  0xa4   : > { %vm421_vm4 = vcmp.eq.f32.partialorder %v237_v41, 0.0  ;;  %vm419_vm5 = vcmp.eq.f32.partialorder %v231_v42, 0.0 }
  0xa5   : > { %v485_v43 = vsel %vm421_vm4, 0.0, %v1115_v30  ;;  %v614_v47 = vsel %vm421_vm4, 1.0, %v237_v41  ;;  %v483_v48 = vsel %vm419_vm5, 0.0, %v1115_v30  ;;  %v612_v49 = vsel %vm419_vm5, 1.0, %v231_v42 }
  0xa6   : > { %550 = vst.msk [vmem:[%s1381_s18 + $0x18] sm:$0xff] %vm546_vm1, %v485_v43  ;;  %983 = vrcp.f32 %v614_v47  ;;  %548 = vst.msk [vmem:[%s1381_s18 + $0x8] sm:$0xff] %vm546_vm1, %v483_v48 }
  0xa7   : > { %985 = vrcp.f32 %v612_v49  ;;  %v243_v53 = vpop.xlane.xlu1 %242  ;;  %v240_v54 = vpop.xlane.xlu0 %239 }
  0xa8   : > { %vm423_vm6 = vcmp.eq.f32.partialorder %v243_v53, 0.0  ;;  %vm422_vm7 = vcmp.eq.f32.partialorder %v240_v54, 0.0 }
  0xa9   : > { %v487_v55 = vsel %vm423_vm6, 0.0, %v1115_v30  ;;  %v616_v59 = vsel %vm423_vm6, 1.0, %v243_v53  ;;  %v486_v60 = vsel %vm422_vm7, 0.0, %v1115_v30  ;;  %v615_v61 = vsel %vm422_vm7, 1.0, %v240_v54 }
  0xaa   : > { %552 = vst.msk [vmem:[%s1381_s18 + $0x28] sm:$0xff] %vm546_vm1, %v487_v55  ;;  %987 = vrcp.f32 %v616_v59  ;;  %551 = vst.msk [vmem:[%s1381_s18 + $0x20] sm:$0xff] %vm546_vm1, %v486_v60 }
  0xab   : > { %989 = vrcp.f32 %v615_v61  ;;  %v249_v3 = vpop.xlane.xlu1 %248  ;;  %v246_v4 = vpop.xlane.xlu0 %245 }
  0xac   : > { %v980_v5 = vpop.eup %979  ;;  %vm425_vm8 = vcmp.eq.f32.partialorder %v249_v3, 0.0  ;;  %vm424_vm9 = vcmp.eq.f32.partialorder %v246_v4, 0.0 }
  0xad   : > { %v982_v9 = vpop.eup %981  ;;  %805 = vst.msk [vmem:[%s1401_s21 + $0x10] sm:$0xff] %vm546_vm1, %v980_v5  ;;  %v489_v10 = vsel %vm425_vm8, 0.0, %v1115_v30  ;;  %v618_v11 = vsel %vm425_vm8, 1.0, %v249_v3  ;;  %v488_v15 = vsel %vm424_vm9, 0.0, %v1115_v30  ;;  %v617_v16 = vsel %vm424_vm9, 1.0, %v246_v4 }
  0xae   : > { %803 = vst.msk [vmem:[%s1401_s21] sm:$0xff] %vm546_vm1, %v982_v9  ;;  %554 = vst.msk [vmem:[%s1381_s18 + $0x38] sm:$0xff] %vm546_vm1, %v489_v10  ;;  %991 = vrcp.f32 %v618_v11 }
  0xaf   : > { %553 = vst.msk [vmem:[%s1381_s18 + $0x30] sm:$0xff] %vm546_vm1, %v488_v15  ;;  %993 = vrcp.f32 %v617_v16  ;;  %v255_v17 = vpop.xlane.xlu1 %254  ;;  %v252_v21 = vpop.xlane.xlu0 %251 }
  0xb0   : > { %v984_v22 = vpop.eup %983  ;;  %vm427_vm10 = vcmp.eq.f32.partialorder %v255_v17, 0.0  ;;  %vm426_vm11 = vcmp.eq.f32.partialorder %v252_v21, 0.0 }
  0xb1   : > { %v986_v26 = vpop.eup %985  ;;  %806 = vst.msk [vmem:[%s1401_s21 + $0x18] sm:$0xff] %vm546_vm1, %v984_v22  ;;  %v491_v28 = vsel %vm427_vm10, 0.0, %v1115_v30  ;;  %v620_v24 = vsel %vm427_vm10, 1.0, %v255_v17  ;;  %v490_v40 = vsel %vm426_vm11, 0.0, %v1115_v30  ;;  %v619_v44 = vsel %vm426_vm11, 1.0, %v252_v21 }
  0xb2   : > { %804 = vst.msk [vmem:[%s1401_s21 + $0x8] sm:$0xff] %vm546_vm1, %v986_v26  ;;  %556 = vst.msk [vmem:[%s1381_s18 + $0x48] sm:$0xff] %vm546_vm1, %v491_v28  ;;  %995 = vrcp.f32 %v620_v24 }
  0xb3   : > { %555 = vst.msk [vmem:[%s1381_s18 + $0x40] sm:$0xff] %vm546_vm1, %v490_v40  ;;  %997 = vrcp.f32 %v619_v44  ;;  %v261_v45 = vpop.xlane.xlu1 %260  ;;  %v258_v46 = vpop.xlane.xlu0 %257 }
  0xb4   : > { %v988_v50 = vpop.eup %987  ;;  %vm429_vm12 = vcmp.eq.f32.partialorder %v261_v45, 0.0  ;;  %vm428_vm13 = vcmp.eq.f32.partialorder %v258_v46, 0.0 }
  0xb5   : > { %v990_v51 = vpop.eup %989  ;;  %808 = vst.msk [vmem:[%s1401_s21 + $0x28] sm:$0xff] %vm546_vm1, %v988_v50  ;;  %v493_v52 = vsel %vm429_vm12, 0.0, %v1115_v30  ;;  %v622_v56 = vsel %vm429_vm12, 1.0, %v261_v45  ;;  %v492_v57 = vsel %vm428_vm13, 0.0, %v1115_v30  ;;  %v621_v58 = vsel %vm428_vm13, 1.0, %v258_v46 }
  0xb6   : > { %807 = vst.msk [vmem:[%s1401_s21 + $0x20] sm:$0xff] %vm546_vm1, %v990_v51  ;;  %558 = vst.msk [vmem:[%s1381_s18 + $0x58] sm:$0xff] %vm546_vm1, %v493_v52  ;;  %999 = vrcp.f32 %v622_v56 }
  0xb7   : > { %557 = vst.msk [vmem:[%s1381_s18 + $0x50] sm:$0xff] %vm546_vm1, %v492_v57  ;;  %1001 = vrcp.f32 %v621_v58  ;;  %v267_v62 = vpop.xlane.xlu1 %266  ;;  %v264_v63 = vpop.xlane.xlu0 %263 }
  0xb8   : > { %v992_v0 = vpop.eup %991  ;;  %vm431_vm14 = vcmp.eq.f32.partialorder %v267_v62, 0.0  ;;  %vm430_vm15 = vcmp.eq.f32.partialorder %v264_v63, 0.0 }
  0xb9   : > { %v994_v1 = vpop.eup %993  ;;  %810 = vst.msk [vmem:[%s1401_s21 + $0x38] sm:$0xff] %vm546_vm1, %v992_v0  ;;  %v495_v2 = vsel %vm431_vm14, 0.0, %v1115_v30  ;;  %v624_v6 = vsel %vm431_vm14, 1.0, %v267_v62  ;;  %v494_v7 = vsel %vm430_vm15, 0.0, %v1115_v30  ;;  %v623_v8 = vsel %vm430_vm15, 1.0, %v264_v63 }
  0xba   : > { %809 = vst.msk [vmem:[%s1401_s21 + $0x30] sm:$0xff] %vm546_vm1, %v994_v1  ;;  %560 = vst.msk [vmem:[%s1381_s18 + $0x68] sm:$0xff] %vm546_vm1, %v495_v2  ;;  %1003 = vrcp.f32 %v624_v6 }
  0xbb   : > { %559 = vst.msk [vmem:[%s1381_s18 + $0x60] sm:$0xff] %vm546_vm1, %v494_v7  ;;  %1005 = vrcp.f32 %v623_v8  ;;  %v273_v12 = vpop.xlane.xlu1 %272  ;;  %v270_v13 = vpop.xlane.xlu0 %269 }
  0xbc   : > { %v996_v14 = vpop.eup %995  ;;  %vm433_vm0 = vcmp.eq.f32.partialorder %v273_v12, 0.0  ;;  %vm432_vm2 = vcmp.eq.f32.partialorder %v270_v13, 0.0 }
  0xbd   : > { %v998_v18 = vpop.eup %997  ;;  %812 = vst.msk [vmem:[%s1401_s21 + $0x48] sm:$0xff] %vm546_vm1, %v996_v14  ;;  %v497_v19 = vsel %vm433_vm0, 0.0, %v1115_v30  ;;  %v626_v20 = vsel %vm433_vm0, 1.0, %v273_v12  ;;  %v496_v27 = vsel %vm432_vm2, 0.0, %v1115_v30  ;;  %v625_v32 = vsel %vm432_vm2, 1.0, %v270_v13 }
  0xbe   : > { %811 = vst.msk [vmem:[%s1401_s21 + $0x40] sm:$0xff] %vm546_vm1, %v998_v18  ;;  %562 = vst.msk [vmem:[%s1381_s18 + $0x78] sm:$0xff] %vm546_vm1, %v497_v19  ;;  %1007 = vrcp.f32 %v626_v20 }
  0xbf   : > { %561 = vst.msk [vmem:[%s1381_s18 + $0x70] sm:$0xff] %vm546_vm1, %v496_v27  ;;  %1009 = vrcp.f32 %v625_v32  ;;  %v279_v33 = vpop.xlane.xlu1 %278  ;;  %v276_v34 = vpop.xlane.xlu0 %275 }
  0xc0   : > { %v1000_v38 = vpop.eup %999  ;;  %vm435_vm3 = vcmp.eq.f32.partialorder %v279_v33, 0.0  ;;  %vm434_vm4 = vcmp.eq.f32.partialorder %v276_v34, 0.0 }
  0xc1   : > { %v1002_v39 = vpop.eup %1001  ;;  %814 = vst.msk [vmem:[%s1401_s21 + $0x58] sm:$0xff] %vm546_vm1, %v1000_v38  ;;  %v499_v23 = vsel %vm435_vm3, 0.0, %v1115_v30  ;;  %v628_v25 = vsel %vm435_vm3, 1.0, %v279_v33  ;;  %v498_v29 = vsel %vm434_vm4, 0.0, %v1115_v30  ;;  %v627_v31 = vsel %vm434_vm4, 1.0, %v276_v34 }
  0xc2   : > { %813 = vst.msk [vmem:[%s1401_s21 + $0x50] sm:$0xff] %vm546_vm1, %v1002_v39  ;;  %564 = vst.msk [vmem:[%s1381_s18 + $0x88] sm:$0xff] %vm546_vm1, %v499_v23  ;;  %1011 = vrcp.f32 %v628_v25 }
  0xc3   : > { %563 = vst.msk [vmem:[%s1381_s18 + $0x80] sm:$0xff] %vm546_vm1, %v498_v29  ;;  %1013 = vrcp.f32 %v627_v31  ;;  %v285_v35 = vpop.xlane.xlu1 %284  ;;  %v282_v36 = vpop.xlane.xlu0 %281 }
  0xc4   : > { %v1004_v37 = vpop.eup %1003  ;;  %vm437_vm5 = vcmp.eq.f32.partialorder %v285_v35, 0.0  ;;  %vm436_vm6 = vcmp.eq.f32.partialorder %v282_v36, 0.0 }
  0xc5   : > { %v1006_v41 = vpop.eup %1005  ;;  %816 = vst.msk [vmem:[%s1401_s21 + $0x68] sm:$0xff] %vm546_vm1, %v1004_v37  ;;  %v501_v42 = vsel %vm437_vm5, 0.0, %v1115_v30  ;;  %v630_v43 = vsel %vm437_vm5, 1.0, %v285_v35  ;;  %v500_v47 = vsel %vm436_vm6, 0.0, %v1115_v30  ;;  %v629_v48 = vsel %vm436_vm6, 1.0, %v282_v36 }
  0xc6   : > { %815 = vst.msk [vmem:[%s1401_s21 + $0x60] sm:$0xff] %vm546_vm1, %v1006_v41  ;;  %566 = vst.msk [vmem:[%s1381_s18 + $0x98] sm:$0xff] %vm546_vm1, %v501_v42  ;;  %1015 = vrcp.f32 %v630_v43 }
  0xc7   : > { %565 = vst.msk [vmem:[%s1381_s18 + $0x90] sm:$0xff] %vm546_vm1, %v500_v47  ;;  %1017 = vrcp.f32 %v629_v48  ;;  %v291_v49 = vpop.xlane.xlu1 %290  ;;  %v288_v53 = vpop.xlane.xlu0 %287 }
  0xc8   : > { %v1008_v54 = vpop.eup %1007  ;;  %vm439_vm7 = vcmp.eq.f32.partialorder %v291_v49, 0.0  ;;  %vm438_vm8 = vcmp.eq.f32.partialorder %v288_v53, 0.0 }
  0xc9   : > { %v1010_v55 = vpop.eup %1009  ;;  %818 = vst.msk [vmem:[%s1401_s21 + $0x78] sm:$0xff] %vm546_vm1, %v1008_v54  ;;  %v503_v59 = vsel %vm439_vm7, 0.0, %v1115_v30  ;;  %v632_v60 = vsel %vm439_vm7, 1.0, %v291_v49  ;;  %v502_v61 = vsel %vm438_vm8, 0.0, %v1115_v30  ;;  %v631_v3 = vsel %vm438_vm8, 1.0, %v288_v53 }
  0xca   : > { %817 = vst.msk [vmem:[%s1401_s21 + $0x70] sm:$0xff] %vm546_vm1, %v1010_v55  ;;  %568 = vst.msk [vmem:[%s1381_s18 + $0xa8] sm:$0xff] %vm546_vm1, %v503_v59  ;;  %1019 = vrcp.f32 %v632_v60 }
  0xcb   : > { %567 = vst.msk [vmem:[%s1381_s18 + $0xa0] sm:$0xff] %vm546_vm1, %v502_v61  ;;  %1021 = vrcp.f32 %v631_v3  ;;  %v297_v4 = vpop.xlane.xlu1 %296  ;;  %v294_v5 = vpop.xlane.xlu0 %293 }
  0xcc   : > { %v1012_v9 = vpop.eup %1011  ;;  %vm441_vm9 = vcmp.eq.f32.partialorder %v297_v4, 0.0  ;;  %vm440_vm10 = vcmp.eq.f32.partialorder %v294_v5, 0.0 }
  0xcd   : > { %v1014_v10 = vpop.eup %1013  ;;  %820 = vst.msk [vmem:[%s1401_s21 + $0x88] sm:$0xff] %vm546_vm1, %v1012_v9  ;;  %v505_v11 = vsel %vm441_vm9, 0.0, %v1115_v30  ;;  %v634_v15 = vsel %vm441_vm9, 1.0, %v297_v4  ;;  %v504_v16 = vsel %vm440_vm10, 0.0, %v1115_v30  ;;  %v633_v17 = vsel %vm440_vm10, 1.0, %v294_v5 }
  0xce   : > { %819 = vst.msk [vmem:[%s1401_s21 + $0x80] sm:$0xff] %vm546_vm1, %v1014_v10  ;;  %570 = vst.msk [vmem:[%s1381_s18 + $0xb8] sm:$0xff] %vm546_vm1, %v505_v11  ;;  %1023 = vrcp.f32 %v634_v15 }
  0xcf   : > { %569 = vst.msk [vmem:[%s1381_s18 + $0xb0] sm:$0xff] %vm546_vm1, %v504_v16  ;;  %1025 = vrcp.f32 %v633_v17  ;;  %v303_v21 = vpop.xlane.xlu1 %302  ;;  %v300_v22 = vpop.xlane.xlu0 %299 }
  0xd0   : > { %v1016_v26 = vpop.eup %1015  ;;  %vm443_vm11 = vcmp.eq.f32.partialorder %v303_v21, 0.0  ;;  %vm442_vm12 = vcmp.eq.f32.partialorder %v300_v22, 0.0 }
  0xd1   : > { %v1018_v28 = vpop.eup %1017  ;;  %822 = vst.msk [vmem:[%s1401_s21 + $0x98] sm:$0xff] %vm546_vm1, %v1016_v26  ;;  %v507_v24 = vsel %vm443_vm11, 0.0, %v1115_v30  ;;  %v636_v40 = vsel %vm443_vm11, 1.0, %v303_v21  ;;  %v506_v44 = vsel %vm442_vm12, 0.0, %v1115_v30  ;;  %v635_v45 = vsel %vm442_vm12, 1.0, %v300_v22 }
  0xd2   : > { %821 = vst.msk [vmem:[%s1401_s21 + $0x90] sm:$0xff] %vm546_vm1, %v1018_v28  ;;  %572 = vst.msk [vmem:[%s1381_s18 + $0xc8] sm:$0xff] %vm546_vm1, %v507_v24  ;;  %1027 = vrcp.f32 %v636_v40 }
  0xd3   : > { %571 = vst.msk [vmem:[%s1381_s18 + $0xc0] sm:$0xff] %vm546_vm1, %v506_v44  ;;  %1029 = vrcp.f32 %v635_v45  ;;  %v309_v46 = vpop.xlane.xlu1 %308  ;;  %v306_v50 = vpop.xlane.xlu0 %305 }
  0xd4   : > { %v1020_v51 = vpop.eup %1019  ;;  %vm445_vm13 = vcmp.eq.f32.partialorder %v309_v46, 0.0  ;;  %vm444_vm14 = vcmp.eq.f32.partialorder %v306_v50, 0.0 }
  0xd5   : > { %v1022_v52 = vpop.eup %1021  ;;  %824 = vst.msk [vmem:[%s1401_s21 + $0xa8] sm:$0xff] %vm546_vm1, %v1020_v51  ;;  %v509_v56 = vsel %vm445_vm13, 0.0, %v1115_v30  ;;  %v638_v57 = vsel %vm445_vm13, 1.0, %v309_v46  ;;  %v508_v58 = vsel %vm444_vm14, 0.0, %v1115_v30  ;;  %v637_v62 = vsel %vm444_vm14, 1.0, %v306_v50 }
  0xd6   : > { %823 = vst.msk [vmem:[%s1401_s21 + $0xa0] sm:$0xff] %vm546_vm1, %v1022_v52  ;;  %574 = vst.msk [vmem:[%s1381_s18 + $0xd8] sm:$0xff] %vm546_vm1, %v509_v56  ;;  %1031 = vrcp.f32 %v638_v57 }
  0xd7   : > { %573 = vst.msk [vmem:[%s1381_s18 + $0xd0] sm:$0xff] %vm546_vm1, %v508_v58  ;;  %1033 = vrcp.f32 %v637_v62  ;;  %v315_v63 = vpop.xlane.xlu1 %314  ;;  %v312_v0 = vpop.xlane.xlu0 %311 }
  0xd8   : > { %v1024_v1 = vpop.eup %1023  ;;  %vm447_vm15 = vcmp.eq.f32.partialorder %v315_v63, 0.0  ;;  %vm446_vm0 = vcmp.eq.f32.partialorder %v312_v0, 0.0 }
  0xd9   : > { %v1026_v2 = vpop.eup %1025  ;;  %826 = vst.msk [vmem:[%s1401_s21 + $0xb8] sm:$0xff] %vm546_vm1, %v1024_v1  ;;  %v511_v6 = vsel %vm447_vm15, 0.0, %v1115_v30  ;;  %v640_v7 = vsel %vm447_vm15, 1.0, %v315_v63  ;;  %v510_v8 = vsel %vm446_vm0, 0.0, %v1115_v30  ;;  %v639_v12 = vsel %vm446_vm0, 1.0, %v312_v0 }
  0xda   : > { %825 = vst.msk [vmem:[%s1401_s21 + $0xb0] sm:$0xff] %vm546_vm1, %v1026_v2  ;;  %576 = vst.msk [vmem:[%s1381_s18 + $0xe8] sm:$0xff] %vm546_vm1, %v511_v6  ;;  %1035 = vrcp.f32 %v640_v7 }
  0xdb   : > { %575 = vst.msk [vmem:[%s1381_s18 + $0xe0] sm:$0xff] %vm546_vm1, %v510_v8  ;;  %1037 = vrcp.f32 %v639_v12  ;;  %v321_v13 = vpop.xlane.xlu1 %320  ;;  %v318_v14 = vpop.xlane.xlu0 %317 }
  0xdc   : > { %v1028_v18 = vpop.eup %1027  ;;  %vm449_vm2 = vcmp.eq.f32.partialorder %v321_v13, 0.0  ;;  %vm448_vm3 = vcmp.eq.f32.partialorder %v318_v14, 0.0 }
  0xdd   : > { %v1030_v19 = vpop.eup %1029  ;;  %828 = vst.msk [vmem:[%s1401_s21 + $0xc8] sm:$0xff] %vm546_vm1, %v1028_v18  ;;  %v513_v20 = vsel %vm449_vm2, 0.0, %v1115_v30  ;;  %v642_v27 = vsel %vm449_vm2, 1.0, %v321_v13  ;;  %v512_v32 = vsel %vm448_vm3, 0.0, %v1115_v30  ;;  %v641_v33 = vsel %vm448_vm3, 1.0, %v318_v14 }
  0xde   : > { %827 = vst.msk [vmem:[%s1401_s21 + $0xc0] sm:$0xff] %vm546_vm1, %v1030_v19  ;;  %578 = vst.msk [vmem:[%s1381_s18 + $0xf8] sm:$0xff] %vm546_vm1, %v513_v20  ;;  %1039 = vrcp.f32 %v642_v27 }
  0xdf   : > { %577 = vst.msk [vmem:[%s1381_s18 + $0xf0] sm:$0xff] %vm546_vm1, %v512_v32  ;;  %1041 = vrcp.f32 %v641_v33  ;;  %v327_v34 = vpop.xlane.xlu1 %326  ;;  %v324_v38 = vpop.xlane.xlu0 %323 }
  0xe0   : > { %v1032_v39 = vpop.eup %1031  ;;  %vm451_vm4 = vcmp.eq.f32.partialorder %v327_v34, 0.0  ;;  %vm450_vm5 = vcmp.eq.f32.partialorder %v324_v38, 0.0 }
  0xe1   : > { %v1034_v23 = vpop.eup %1033  ;;  %830 = vst.msk [vmem:[%s1401_s21 + $0xd8] sm:$0xff] %vm546_vm1, %v1032_v39  ;;  %v515_v25 = vsel %vm451_vm4, 0.0, %v1115_v30  ;;  %v644_v29 = vsel %vm451_vm4, 1.0, %v327_v34  ;;  %v514_v31 = vsel %vm450_vm5, 0.0, %v1115_v30  ;;  %v643_v35 = vsel %vm450_vm5, 1.0, %v324_v38 }
  0xe2   : > { %829 = vst.msk [vmem:[%s1401_s21 + $0xd0] sm:$0xff] %vm546_vm1, %v1034_v23  ;;  %580 = vst.msk [vmem:[%s1381_s18 + $0x108] sm:$0xff] %vm546_vm1, %v515_v25  ;;  %1043 = vrcp.f32 %v644_v29 }
  0xe3   : > { %579 = vst.msk [vmem:[%s1381_s18 + $0x100] sm:$0xff] %vm546_vm1, %v514_v31  ;;  %1045 = vrcp.f32 %v643_v35  ;;  %v333_v36 = vpop.xlane.xlu1 %332  ;;  %v330_v37 = vpop.xlane.xlu0 %329 }
  0xe4   : > { %v1036_v41 = vpop.eup %1035  ;;  %vm453_vm6 = vcmp.eq.f32.partialorder %v333_v36, 0.0  ;;  %vm452_vm7 = vcmp.eq.f32.partialorder %v330_v37, 0.0 }
  0xe5   : > { %v1038_v42 = vpop.eup %1037  ;;  %832 = vst.msk [vmem:[%s1401_s21 + $0xe8] sm:$0xff] %vm546_vm1, %v1036_v41  ;;  %v517_v43 = vsel %vm453_vm6, 0.0, %v1115_v30  ;;  %v646_v47 = vsel %vm453_vm6, 1.0, %v333_v36  ;;  %v516_v48 = vsel %vm452_vm7, 0.0, %v1115_v30  ;;  %v645_v49 = vsel %vm452_vm7, 1.0, %v330_v37 }
  0xe6   : > { %831 = vst.msk [vmem:[%s1401_s21 + $0xe0] sm:$0xff] %vm546_vm1, %v1038_v42  ;;  %582 = vst.msk [vmem:[%s1381_s18 + $0x118] sm:$0xff] %vm546_vm1, %v517_v43  ;;  %1047 = vrcp.f32 %v646_v47 }
  0xe7   : > { %581 = vst.msk [vmem:[%s1381_s18 + $0x110] sm:$0xff] %vm546_vm1, %v516_v48  ;;  %1049 = vrcp.f32 %v645_v49  ;;  %v339_v53 = vpop.xlane.xlu1 %338  ;;  %v336_v54 = vpop.xlane.xlu0 %335 }
  0xe8   : > { %v1040_v55 = vpop.eup %1039  ;;  %vm455_vm8 = vcmp.eq.f32.partialorder %v339_v53, 0.0  ;;  %vm454_vm9 = vcmp.eq.f32.partialorder %v336_v54, 0.0 }
  0xe9   : > { %v1042_v59 = vpop.eup %1041  ;;  %834 = vst.msk [vmem:[%s1401_s21 + $0xf8] sm:$0xff] %vm546_vm1, %v1040_v55  ;;  %v519_v60 = vsel %vm455_vm8, 0.0, %v1115_v30  ;;  %v648_v61 = vsel %vm455_vm8, 1.0, %v339_v53  ;;  %v518_v3 = vsel %vm454_vm9, 0.0, %v1115_v30  ;;  %v647_v4 = vsel %vm454_vm9, 1.0, %v336_v54 }
  0xea   : > { %833 = vst.msk [vmem:[%s1401_s21 + $0xf0] sm:$0xff] %vm546_vm1, %v1042_v59  ;;  %584 = vst.msk [vmem:[%s1381_s18 + $0x128] sm:$0xff] %vm546_vm1, %v519_v60  ;;  %1051 = vrcp.f32 %v648_v61 }
  0xeb   : > { %583 = vst.msk [vmem:[%s1381_s18 + $0x120] sm:$0xff] %vm546_vm1, %v518_v3  ;;  %1053 = vrcp.f32 %v647_v4  ;;  %v345_v5 = vpop.xlane.xlu1 %344  ;;  %v342_v9 = vpop.xlane.xlu0 %341 }
  0xec   : > { %v1044_v10 = vpop.eup %1043  ;;  %vm457_vm10 = vcmp.eq.f32.partialorder %v345_v5, 0.0  ;;  %vm456_vm11 = vcmp.eq.f32.partialorder %v342_v9, 0.0 }
  0xed   : > { %v1046_v11 = vpop.eup %1045  ;;  %836 = vst.msk [vmem:[%s1401_s21 + $0x108] sm:$0xff] %vm546_vm1, %v1044_v10  ;;  %v521_v15 = vsel %vm457_vm10, 0.0, %v1115_v30  ;;  %v650_v16 = vsel %vm457_vm10, 1.0, %v345_v5  ;;  %v520_v17 = vsel %vm456_vm11, 0.0, %v1115_v30  ;;  %v649_v21 = vsel %vm456_vm11, 1.0, %v342_v9 }
  0xee   : > { %835 = vst.msk [vmem:[%s1401_s21 + $0x100] sm:$0xff] %vm546_vm1, %v1046_v11  ;;  %586 = vst.msk [vmem:[%s1381_s18 + $0x138] sm:$0xff] %vm546_vm1, %v521_v15  ;;  %1055 = vrcp.f32 %v650_v16 }
  0xef   : > { %585 = vst.msk [vmem:[%s1381_s18 + $0x130] sm:$0xff] %vm546_vm1, %v520_v17  ;;  %1057 = vrcp.f32 %v649_v21  ;;  %v351_v22 = vpop.xlane.xlu1 %350  ;;  %v348_v26 = vpop.xlane.xlu0 %347 }
  0xf0   : > { %v1048_v28 = vpop.eup %1047  ;;  %vm459_vm12 = vcmp.eq.f32.partialorder %v351_v22, 0.0  ;;  %vm458_vm13 = vcmp.eq.f32.partialorder %v348_v26, 0.0 }
  0xf1   : > { %v1050_v24 = vpop.eup %1049  ;;  %838 = vst.msk [vmem:[%s1401_s21 + $0x118] sm:$0xff] %vm546_vm1, %v1048_v28  ;;  %v523_v40 = vsel %vm459_vm12, 0.0, %v1115_v30  ;;  %v652_v44 = vsel %vm459_vm12, 1.0, %v351_v22  ;;  %v522_v45 = vsel %vm458_vm13, 0.0, %v1115_v30  ;;  %v651_v46 = vsel %vm458_vm13, 1.0, %v348_v26 }
  0xf2   : > { %837 = vst.msk [vmem:[%s1401_s21 + $0x110] sm:$0xff] %vm546_vm1, %v1050_v24  ;;  %588 = vst.msk [vmem:[%s1381_s18 + $0x148] sm:$0xff] %vm546_vm1, %v523_v40  ;;  %1059 = vrcp.f32 %v652_v44 }
  0xf3   : > { %587 = vst.msk [vmem:[%s1381_s18 + $0x140] sm:$0xff] %vm546_vm1, %v522_v45  ;;  %1061 = vrcp.f32 %v651_v46  ;;  %v357_v50 = vpop.xlane.xlu1 %356  ;;  %v354_v51 = vpop.xlane.xlu0 %353 }
  0xf4   : > { %v1052_v52 = vpop.eup %1051  ;;  %vm461_vm14 = vcmp.eq.f32.partialorder %v357_v50, 0.0  ;;  %vm460_vm15 = vcmp.eq.f32.partialorder %v354_v51, 0.0 }
  0xf5   : > { %v1054_v56 = vpop.eup %1053  ;;  %840 = vst.msk [vmem:[%s1401_s21 + $0x128] sm:$0xff] %vm546_vm1, %v1052_v52  ;;  %v525_v57 = vsel %vm461_vm14, 0.0, %v1115_v30  ;;  %v654_v58 = vsel %vm461_vm14, 1.0, %v357_v50  ;;  %v524_v62 = vsel %vm460_vm15, 0.0, %v1115_v30  ;;  %v653_v63 = vsel %vm460_vm15, 1.0, %v354_v51 }
  0xf6   : > { %839 = vst.msk [vmem:[%s1401_s21 + $0x120] sm:$0xff] %vm546_vm1, %v1054_v56  ;;  %590 = vst.msk [vmem:[%s1381_s18 + $0x158] sm:$0xff] %vm546_vm1, %v525_v57  ;;  %1063 = vrcp.f32 %v654_v58 }
  0xf7   : > { %589 = vst.msk [vmem:[%s1381_s18 + $0x150] sm:$0xff] %vm546_vm1, %v524_v62  ;;  %1065 = vrcp.f32 %v653_v63  ;;  %v363_v0 = vpop.xlane.xlu1 %362  ;;  %v360_v1 = vpop.xlane.xlu0 %359 }
  0xf8   : > { %v1056_v2 = vpop.eup %1055  ;;  %vm463_vm0 = vcmp.eq.f32.partialorder %v363_v0, 0.0  ;;  %vm462_vm2 = vcmp.eq.f32.partialorder %v360_v1, 0.0 }
  0xf9   : > { %v1058_v6 = vpop.eup %1057  ;;  %842 = vst.msk [vmem:[%s1401_s21 + $0x138] sm:$0xff] %vm546_vm1, %v1056_v2  ;;  %v527_v7 = vsel %vm463_vm0, 0.0, %v1115_v30  ;;  %v656_v8 = vsel %vm463_vm0, 1.0, %v363_v0  ;;  %v526_v12 = vsel %vm462_vm2, 0.0, %v1115_v30  ;;  %v655_v13 = vsel %vm462_vm2, 1.0, %v360_v1 }
  0xfa   : > { %841 = vst.msk [vmem:[%s1401_s21 + $0x130] sm:$0xff] %vm546_vm1, %v1058_v6  ;;  %592 = vst.msk [vmem:[%s1381_s18 + $0x168] sm:$0xff] %vm546_vm1, %v527_v7  ;;  %1067 = vrcp.f32 %v656_v8 }
  0xfb   : > { %591 = vst.msk [vmem:[%s1381_s18 + $0x160] sm:$0xff] %vm546_vm1, %v526_v12  ;;  %1069 = vrcp.f32 %v655_v13  ;;  %v369_v14 = vpop.xlane.xlu1 %368  ;;  %v366_v18 = vpop.xlane.xlu0 %365 }
  0xfc   : > { %v1060_v19 = vpop.eup %1059  ;;  %vm465_vm3 = vcmp.eq.f32.partialorder %v369_v14, 0.0  ;;  %vm464_vm4 = vcmp.eq.f32.partialorder %v366_v18, 0.0 }
  0xfd   : > { %v1062_v20 = vpop.eup %1061  ;;  %844 = vst.msk [vmem:[%s1401_s21 + $0x148] sm:$0xff] %vm546_vm1, %v1060_v19  ;;  %v529_v27 = vsel %vm465_vm3, 0.0, %v1115_v30  ;;  %v658_v32 = vsel %vm465_vm3, 1.0, %v369_v14  ;;  %v528_v33 = vsel %vm464_vm4, 0.0, %v1115_v30  ;;  %v657_v34 = vsel %vm464_vm4, 1.0, %v366_v18 }
  0xfe   : > { %843 = vst.msk [vmem:[%s1401_s21 + $0x140] sm:$0xff] %vm546_vm1, %v1062_v20  ;;  %594 = vst.msk [vmem:[%s1381_s18 + $0x178] sm:$0xff] %vm546_vm1, %v529_v27  ;;  %1071 = vrcp.f32 %v658_v32 }
  0xff   : > { %593 = vst.msk [vmem:[%s1381_s18 + $0x170] sm:$0xff] %vm546_vm1, %v528_v33  ;;  %1073 = vrcp.f32 %v657_v34  ;;  %v375_v38 = vpop.xlane.xlu1 %374  ;;  %v372_v39 = vpop.xlane.xlu0 %371 }
 0x100   : > { %v1064_v23 = vpop.eup %1063  ;;  %vm467_vm5 = vcmp.eq.f32.partialorder %v375_v38, 0.0  ;;  %vm466_vm6 = vcmp.eq.f32.partialorder %v372_v39, 0.0 }
 0x101   : > { %v1066_v25 = vpop.eup %1065  ;;  %846 = vst.msk [vmem:[%s1401_s21 + $0x158] sm:$0xff] %vm546_vm1, %v1064_v23  ;;  %v531_v29 = vsel %vm467_vm5, 0.0, %v1115_v30  ;;  %v660_v31 = vsel %vm467_vm5, 1.0, %v375_v38  ;;  %v530_v35 = vsel %vm466_vm6, 0.0, %v1115_v30  ;;  %v659_v36 = vsel %vm466_vm6, 1.0, %v372_v39 }
 0x102   : > { %845 = vst.msk [vmem:[%s1401_s21 + $0x150] sm:$0xff] %vm546_vm1, %v1066_v25  ;;  %596 = vst.msk [vmem:[%s1381_s18 + $0x188] sm:$0xff] %vm546_vm1, %v531_v29  ;;  %1075 = vrcp.f32 %v660_v31 }
 0x103   : > { %595 = vst.msk [vmem:[%s1381_s18 + $0x180] sm:$0xff] %vm546_vm1, %v530_v35  ;;  %1077 = vrcp.f32 %v659_v36  ;;  %v381_v37 = vpop.xlane.xlu1 %380  ;;  %v378_v41 = vpop.xlane.xlu0 %377 }
 0x104   : > { %v1068_v42 = vpop.eup %1067  ;;  %vm469_vm7 = vcmp.eq.f32.partialorder %v381_v37, 0.0  ;;  %vm468_vm8 = vcmp.eq.f32.partialorder %v378_v41, 0.0 }
 0x105   : > { %v1070_v43 = vpop.eup %1069  ;;  %848 = vst.msk [vmem:[%s1401_s21 + $0x168] sm:$0xff] %vm546_vm1, %v1068_v42  ;;  %v533_v47 = vsel %vm469_vm7, 0.0, %v1115_v30  ;;  %v662_v48 = vsel %vm469_vm7, 1.0, %v381_v37  ;;  %v532_v49 = vsel %vm468_vm8, 0.0, %v1115_v30  ;;  %v661_v53 = vsel %vm468_vm8, 1.0, %v378_v41 }
 0x106   : > { %847 = vst.msk [vmem:[%s1401_s21 + $0x160] sm:$0xff] %vm546_vm1, %v1070_v43  ;;  %598 = vst.msk [vmem:[%s1381_s18 + $0x198] sm:$0xff] %vm546_vm1, %v533_v47  ;;  %1079 = vrcp.f32 %v662_v48 }
 0x107   : > { %597 = vst.msk [vmem:[%s1381_s18 + $0x190] sm:$0xff] %vm546_vm1, %v532_v49  ;;  %1081 = vrcp.f32 %v661_v53  ;;  %v387_v54 = vpop.xlane.xlu1 %386  ;;  %v384_v55 = vpop.xlane.xlu0 %383 }
 0x108   : > { %v1072_v59 = vpop.eup %1071  ;;  %vm471_vm9 = vcmp.eq.f32.partialorder %v387_v54, 0.0  ;;  %vm470_vm10 = vcmp.eq.f32.partialorder %v384_v55, 0.0 }
 0x109   : > { %v1074_v60 = vpop.eup %1073  ;;  %850 = vst.msk [vmem:[%s1401_s21 + $0x178] sm:$0xff] %vm546_vm1, %v1072_v59  ;;  %v535_v61 = vsel %vm471_vm9, 0.0, %v1115_v30  ;;  %v664_v3 = vsel %vm471_vm9, 1.0, %v387_v54  ;;  %v534_v4 = vsel %vm470_vm10, 0.0, %v1115_v30  ;;  %v663_v5 = vsel %vm470_vm10, 1.0, %v384_v55 }
 0x10a   : > { %849 = vst.msk [vmem:[%s1401_s21 + $0x170] sm:$0xff] %vm546_vm1, %v1074_v60  ;;  %600 = vst.msk [vmem:[%s1381_s18 + $0x1a8] sm:$0xff] %vm546_vm1, %v535_v61  ;;  %1083 = vrcp.f32 %v664_v3 }
 0x10b   : > { %599 = vst.msk [vmem:[%s1381_s18 + $0x1a0] sm:$0xff] %vm546_vm1, %v534_v4  ;;  %1085 = vrcp.f32 %v663_v5  ;;  %v393_v9 = vpop.xlane.xlu1 %392  ;;  %v390_v10 = vpop.xlane.xlu0 %389 }
 0x10c   : > { %v1076_v11 = vpop.eup %1075  ;;  %vm473_vm11 = vcmp.eq.f32.partialorder %v393_v9, 0.0  ;;  %vm472_vm12 = vcmp.eq.f32.partialorder %v390_v10, 0.0 }
 0x10d   : > { %v1078_v15 = vpop.eup %1077  ;;  %852 = vst.msk [vmem:[%s1401_s21 + $0x188] sm:$0xff] %vm546_vm1, %v1076_v11  ;;  %v537_v16 = vsel %vm473_vm11, 0.0, %v1115_v30  ;;  %v666_v17 = vsel %vm473_vm11, 1.0, %v393_v9  ;;  %v536_v21 = vsel %vm472_vm12, 0.0, %v1115_v30  ;;  %v665_v22 = vsel %vm472_vm12, 1.0, %v390_v10 }
 0x10e   : > { %851 = vst.msk [vmem:[%s1401_s21 + $0x180] sm:$0xff] %vm546_vm1, %v1078_v15  ;;  %602 = vst.msk [vmem:[%s1381_s18 + $0x1b8] sm:$0xff] %vm546_vm1, %v537_v16  ;;  %1087 = vrcp.f32 %v666_v17 }
 0x10f   : > { %601 = vst.msk [vmem:[%s1381_s18 + $0x1b0] sm:$0xff] %vm546_vm1, %v536_v21  ;;  %1089 = vrcp.f32 %v665_v22  ;;  %v399_v26 = vpop.xlane.xlu1 %398  ;;  %v396_v28 = vpop.xlane.xlu0 %395 }
 0x110   : > { %v1080_v24 = vpop.eup %1079  ;;  %vm475_vm13 = vcmp.eq.f32.partialorder %v399_v26, 0.0  ;;  %vm474_vm14 = vcmp.eq.f32.partialorder %v396_v28, 0.0 }
 0x111   : > { %v1082_v40 = vpop.eup %1081  ;;  %854 = vst.msk [vmem:[%s1401_s21 + $0x198] sm:$0xff] %vm546_vm1, %v1080_v24  ;;  %v539_v44 = vsel %vm475_vm13, 0.0, %v1115_v30  ;;  %v668_v45 = vsel %vm475_vm13, 1.0, %v399_v26  ;;  %v538_v46 = vsel %vm474_vm14, 0.0, %v1115_v30  ;;  %v667_v50 = vsel %vm474_vm14, 1.0, %v396_v28 }
 0x112   : > { %853 = vst.msk [vmem:[%s1401_s21 + $0x190] sm:$0xff] %vm546_vm1, %v1082_v40  ;;  %604 = vst.msk [vmem:[%s1381_s18 + $0x1c8] sm:$0xff] %vm546_vm1, %v539_v44  ;;  %1091 = vrcp.f32 %v668_v45 }
 0x113   : > { %603 = vst.msk [vmem:[%s1381_s18 + $0x1c0] sm:$0xff] %vm546_vm1, %v538_v46  ;;  %1093 = vrcp.f32 %v667_v50  ;;  %v405_v51 = vpop.xlane.xlu1 %404  ;;  %v402_v52 = vpop.xlane.xlu0 %401 }
 0x114   : > { %v1084_v56 = vpop.eup %1083  ;;  %vm477_vm15 = vcmp.eq.f32.partialorder %v405_v51, 0.0  ;;  %vm476_vm0 = vcmp.eq.f32.partialorder %v402_v52, 0.0 }
 0x115   : > { %v1086_v57 = vpop.eup %1085  ;;  %856 = vst.msk [vmem:[%s1401_s21 + $0x1a8] sm:$0xff] %vm546_vm1, %v1084_v56  ;;  %v541_v58 = vsel %vm477_vm15, 0.0, %v1115_v30  ;;  %v670_v62 = vsel %vm477_vm15, 1.0, %v405_v51  ;;  %v540_v63 = vsel %vm476_vm0, 0.0, %v1115_v30  ;;  %v669_v0 = vsel %vm476_vm0, 1.0, %v402_v52 }
 0x116   : > { %855 = vst.msk [vmem:[%s1401_s21 + $0x1a0] sm:$0xff] %vm546_vm1, %v1086_v57  ;;  %606 = vst.msk [vmem:[%s1381_s18 + $0x1d8] sm:$0xff] %vm546_vm1, %v541_v58  ;;  %1095 = vrcp.f32 %v670_v62 }
 0x117   : > { %605 = vst.msk [vmem:[%s1381_s18 + $0x1d0] sm:$0xff] %vm546_vm1, %v540_v63  ;;  %1097 = vrcp.f32 %v669_v0  ;;  %v411_v1 = vpop.xlane.xlu1 %410  ;;  %v408_v2 = vpop.xlane.xlu0 %407 }
 0x118   : > { %v1088_v6 = vpop.eup %1087  ;;  %vm479_vm2 = vcmp.eq.f32.partialorder %v411_v1, 0.0  ;;  %vm478_vm3 = vcmp.eq.f32.partialorder %v408_v2, 0.0 }
 0x119   : > { %v1090_v7 = vpop.eup %1089  ;;  %858 = vst.msk [vmem:[%s1401_s21 + $0x1b8] sm:$0xff] %vm546_vm1, %v1088_v6  ;;  %v543_v8 = vsel %vm479_vm2, 0.0, %v1115_v30  ;;  %v672_v12 = vsel %vm479_vm2, 1.0, %v411_v1  ;;  %v542_v13 = vsel %vm478_vm3, 0.0, %v1115_v30  ;;  %v671_v14 = vsel %vm478_vm3, 1.0, %v408_v2 }
 0x11a   : > { %857 = vst.msk [vmem:[%s1401_s21 + $0x1b0] sm:$0xff] %vm546_vm1, %v1090_v7  ;;  %608 = vst.msk [vmem:[%s1381_s18 + $0x1e8] sm:$0xff] %vm546_vm1, %v543_v8  ;;  %1099 = vrcp.f32 %v672_v12 }
 0x11b   : > { %607 = vst.msk [vmem:[%s1381_s18 + $0x1e0] sm:$0xff] %vm546_vm1, %v542_v13  ;;  %1101 = vrcp.f32 %v671_v14  ;;  %v417_v18 = vpop.xlane.xlu1 %416  ;;  %v414_v19 = vpop.xlane.xlu0 %413 }
 0x11c   : > { %v1092_v20 = vpop.eup %1091  ;;  %vm481_vm4 = vcmp.eq.f32.partialorder %v417_v18, 0.0  ;;  %vm480_vm5 = vcmp.eq.f32.partialorder %v414_v19, 0.0 }
 0x11d   : > { %v1094_v27 = vpop.eup %1093  ;;  %860 = vst.msk [vmem:[%s1401_s21 + $0x1c8] sm:$0xff] %vm546_vm1, %v1092_v20  ;;  %v545_v32 = vsel %vm481_vm4, 0.0, %v1115_v30  ;;  %v674_v33 = vsel %vm481_vm4, 1.0, %v417_v18  ;;  %v544_v34 = vsel %vm480_vm5, 0.0, %v1115_v30  ;;  %v673_v38 = vsel %vm480_vm5, 1.0, %v414_v19 }
 0x11e   : > { %859 = vst.msk [vmem:[%s1401_s21 + $0x1c0] sm:$0xff] %vm546_vm1, %v1094_v27  ;;  %610 = vst.msk [vmem:[%s1381_s18 + $0x1f8] sm:$0xff] %vm546_vm1, %v545_v32  ;;  %1103 = vrcp.f32 %v674_v33 }
 0x11f   : > { %609 = vst.msk [vmem:[%s1381_s18 + $0x1f0] sm:$0xff] %vm546_vm1, %v544_v34  ;;  %1105 = vrcp.f32 %v673_v38 }
 0x120   : > { %v1096_v39 = vpop.eup %1095 }
 0x121   : > { %v1098_v23 = vpop.eup %1097  ;;  %862 = vst.msk [vmem:[%s1401_s21 + $0x1d8] sm:$0xff] %vm546_vm1, %v1096_v39 }
 0x122   : > { %861 = vst.msk [vmem:[%s1401_s21 + $0x1d0] sm:$0xff] %vm546_vm1, %v1098_v23 }
 0x124   : > { %v1100_v25 = vpop.eup %1099 }
 0x125   : > { %v1102_v29 = vpop.eup %1101  ;;  %864 = vst.msk [vmem:[%s1401_s21 + $0x1e8] sm:$0xff] %vm546_vm1, %v1100_v25 }
 0x126   : > { %863 = vst.msk [vmem:[%s1401_s21 + $0x1e0] sm:$0xff] %vm546_vm1, %v1102_v29 }
 0x128   : > { %v1104_v30 = vpop.eup %1103 }
 0x129   : > { %v1106_v31 = vpop.eup %1105  ;;  %866 = vst.msk [vmem:[%s1401_s21 + $0x1f8] sm:$0xff] %vm546_vm1, %v1104_v30 }
 0x12a   : > { %865 = vst.msk [vmem:[%s1401_s21 + $0x1f0] sm:$0xff] %vm546_vm1, %v1106_v31 }
 0x12b PF: > { %s13_s9 = sadd.s32 1, %s1113_s9  }
 0x12c   : > { %p10_p4 = scmp.ge.s32.totalorder %s13_s9, 6  }
 0x12e   :  { %12 = sbr.rel (!%p10_p4) target bundleno = 1 (0x1), region = 66 }

</bundles_post_ra>
